<compile_context>
chip_gen: v6e
topology: v6e:2x2x1
jax: 0.10.0
libtpu: 0.0.40
codegen_flags: <defaults>
</compile_context>

<pallas_src>
import functools
import math

import jax
import jax.numpy as jnp
from jax.experimental import pallas as pl
from jax.experimental.pallas import tpu as pltpu

_MIB = 1024 * 1024
# Cap on the live VMEM working set (double-buffered in/out tiles + f32 temps):
# comfortable on every generation, including v7x's 64 MiB per-TensorCore VMEM.
_LIVE_VMEM_BUDGET = 24 * _MIB


def _sublane_packing(*dtypes):
    """Row granularity so blocks of every dtype stay fully sublane-packed."""
    pack = 8
    for dt in dtypes:
        pack = max(pack, 32 // max(jnp.dtype(dt).itemsize, 1))
    return pack


def _hbm_tile_target():
    """(target input-tile bytes, min grid steps) per chip generation."""
    try:
        kind = jax.devices()[0].device_kind.lower()
    except Exception:
        kind = ""
    if "v7" in kind or "7x" in kind:
        return 4 * _MIB, 16
    if "v6" in kind:
        return 2 * _MIB, 8
    return 1 * _MIB, 8  # v5e / older / unknown


def _choose_tile_rows(rows, d, in_bytes, out_bytes, sublane, target_bytes, min_steps):
    """Largest sublane-multiple row tile such that:
       * the input tile is ~target_bytes (per-step DMA >> ~0.35us step overhead),
       * double-buffered in/out tiles plus the f32 temporaries fit the live
         VMEM budget,
       * the grid keeps >= min_steps steps when rows allow it.
    Prefers an exact divisor of rows (fully unmasked final block)."""
    if rows <= sublane:
        return max(rows, 1)
    per_row_in = d * in_bytes
    per_row_live = 2 * d * (in_bytes + out_bytes) + 2 * d * 4  # dbl-buf io + x32/normed
    cap = min(target_bytes // max(per_row_in, 1),
              _LIVE_VMEM_BUDGET // max(per_row_live, 1),
              max(rows // min_steps, sublane))
    cap = max(sublane, min(cap, rows) // sublane * sublane)
    t = cap
    while t >= sublane and 2 * t >= cap:  # divisor search, don't drop below cap/2
        if rows % t == 0:
            return t
        t -= sublane
    return cap


def _rmsnorm_kernel(x_ref, w_ref, o_ref, *, eps):
    # x_ref: (TILE, D), w_ref: (1, D), o_ref: (TILE, D)
    x32 = x_ref[...].astype(jnp.float32)
    var = jnp.mean(x32 * x32, axis=-1, keepdims=True)
    normed = x32 * jax.lax.rsqrt(var + eps)  # EUP rsqrt
    w = w_ref[...]
    # Matches torch: cast to the weight dtype before the affine scale
    # (a no-op for the default f32 weight).
    o_ref[...] = (normed.astype(w.dtype) * w).astype(o_ref.dtype)


def _rmsnorm_folded_kernel(x_ref, w_ref, m_ref, o_ref, *, eps, inv_d):
    # x_ref: (TILE, fold*D) — `fold` logical rows share one 128-lane row.
    x32 = x_ref[...].astype(jnp.float32)
    sq = x32 * x32
    # Per-D-segment sums broadcast back to every lane via a block-diagonal ones
    # matrix on the (otherwise idle) MXU; HIGHEST precision keeps f32 accuracy.
    seg = jnp.dot(sq, m_ref[...], preferred_element_type=jnp.float32,
                  precision=jax.lax.Precision.HIGHEST)
    normed = x32 * jax.lax.rsqrt(seg * inv_d + eps)
    w = w_ref[...]
    o_ref[...] = (normed.astype(w.dtype) * w).astype(o_ref.dtype)


def rms_norm(x, weight, eps, *, out_dtype=None, tile_rows=None, donate_input=False):
    """RMSNorm over the last axis.

    x: (..., D).  weight: (D,) array or None (elementwise_affine=False).
    Output dtype follows the PyTorch module: weight dtype for a 16-bit weight,
    f32 for an f32 weight, input dtype when weight is None.
    """
    orig_shape = x.shape
    D = orig_shape[-1]
    rows = math.prod(orig_shape[:-1])
    in_dt = jnp.dtype(x.dtype)

    if weight is None:
        w1d = jnp.ones((D,), dtype=jnp.float32)
        out_dt = in_dt
    else:
        w1d = weight.reshape(D)
        out_dt = jnp.dtype(weight.dtype)
    if out_dtype is not None:
        out_dt = jnp.dtype(out_dtype)

    # Lane-dense folding for small feature dims: pack `fold` consecutive rows
    # into one 128-lane row (free row-major reshape) so DMAs/stores are never
    # lane-masked.
    fold = 1
    if D < 128 and 128 % D == 0:
        f = 128 // D
        if f > 1 and rows % f == 0 and rows >= f:
            fold = f
    # TODO(synk): if production D is >= 128 but not a multiple of 128, lane-pad D
    # (with a true-D divisor in the variance) so stores stay lane-dense.

    d_lanes = fold * D
    rows_k = rows // fold
    x2d = x.reshape(rows_k, d_lanes)               # free reshape (row-major)
    w2d = jnp.tile(w1d, fold).reshape(1, d_lanes)  # weight pattern repeats per fold

    in_bytes = in_dt.itemsize
    out_bytes = out_dt.itemsize
    sublane = _sublane_packing(in_dt, out_dt)
    target_bytes, min_steps = _hbm_tile_target()
    if tile_rows is None:
        tile_rows = _choose_tile_rows(rows_k, d_lanes, in_bytes, out_bytes,
                                      sublane, target_bytes, min_steps)
    tile_rows = max(1, min(tile_rows, rows_k))
    grid = (pl.cdiv(rows_k, tile_rows),)  # ragged final block: Pallas masks the store

    # Scoped-VMEM limit: actual double-buffered footprint + f32 temps + headroom,
    # capped to stay comfortable within v7x's 64 MiB per-TensorCore VMEM.
    tile_elems = tile_rows * d_lanes
    required = (2 * tile_elems * (in_bytes + out_bytes)   # double-buffered in/out
                + 2 * tile_elems * 4                      # x32 / normed temporaries
                + d_lanes * (4 + 4 * d_lanes)             # weight + ones matrix
                + 4 * _MIB)                               # compiler scratch headroom
    vmem_limit = int(min(56 * _MIB, max(20 * _MIB, required + 4 * _MIB)))

    common = dict(
        out_shape=jax.ShapeDtypeStruct((rows_k, d_lanes), out_dt),
        compiler_params=pltpu.CompilerParams(
            # "parallel" lets the row axis shard across v7x's two TensorCores.
            dimension_semantics=("parallel",),
            vmem_limit_bytes=vmem_limit,
        ),
    )
    if donate_input and in_dt == out_dt:
        # Caller guarantees x is dead: reuse its HBM buffer, dropping one stream.
        common["input_output_aliases"] = {0: 0}

    if fold > 1:
        seg = jnp.arange(d_lanes) // D
        ones_blk = (seg[:, None] == seg[None, :]).astype(jnp.float32)
        out2d = pl.pallas_call(
            functools.partial(_rmsnorm_folded_kernel, eps=float(eps), inv_d=1.0 / D),
            grid_spec=pltpu.PrefetchScalarGridSpec(
                num_scalar_prefetch=0,
                grid=grid,
                in_specs=[
                    pl.BlockSpec((tile_rows, d_lanes), lambda i: (i, 0)),
                    pl.BlockSpec((1, d_lanes), lambda i: (0, 0)),        # resident
                    pl.BlockSpec((d_lanes, d_lanes), lambda i: (0, 0)),  # resident
                ],
                out_specs=pl.BlockSpec((tile_rows, d_lanes), lambda i: (i, 0)),
            ),
            **common,
        )(x2d, w2d, ones_blk)
    else:
        out2d = pl.pallas_call(
            functools.partial(_rmsnorm_kernel, eps=float(eps)),
            grid_spec=pltpu.PrefetchScalarGridSpec(
                num_scalar_prefetch=0,
                grid=grid,
                in_specs=[
                    pl.BlockSpec((tile_rows, d_lanes), lambda i: (i, 0)),
                    pl.BlockSpec((1, d_lanes), lambda i: (0, 0)),        # resident
                ],
                out_specs=pl.BlockSpec((tile_rows, d_lanes), lambda i: (i, 0)),
            ),
            **common,
        )(x2d, w2d)

    return out2d.reshape(orig_shape)


def rms_norm_ref(x, weight, eps):
    """Pure-JAX reference mirroring the PyTorch forward."""
    x32 = x.astype(jnp.float32)
    variance = jnp.mean(x32 * x32, axis=-1, keepdims=True)
    normed = x32 * jax.lax.rsqrt(variance + eps)
    if weight is None:
        return normed.astype(x.dtype)
    return normed.astype(weight.dtype) * weight


if __name__ == "__main__":
    key = jax.random.PRNGKey(0)
    eps = 1e-6
    D = 32
    k1, k2, k3 = jax.random.split(key, 3)
    weight = jnp.ones((D,), jnp.float32) + 0.01 * jnp.arange(D, dtype=jnp.float32)

    # Case 1: default module config (f32 in, f32 weight -> f32 out), folded path.
    x = jax.random.normal(k1, (2, 4, 16, D), dtype=jnp.float32)
    out = jax.block_until_ready(rms_norm(x, weight, eps))
    ref = rms_norm_ref(x, weight, eps)
    assert out.shape == x.shape and out.dtype == jnp.float32
    assert jnp.allclose(out, ref, atol=1e-5, rtol=1e-5)

    # Case 2: rows (15) not divisible by fold/tile -> un-folded path + ragged block.
    x2 = jax.random.normal(k2, (3, 5, D), dtype=jnp.float32)
    out2 = jax.block_until_ready(rms_norm(x2, weight, eps))
    ref2 = rms_norm_ref(x2, weight, eps)
    assert out2.shape == x2.shape
    assert jnp.allclose(out2, ref2, atol=1e-5, rtol=1e-5)

    # Case 3: bf16 input + bf16 weight -> bf16 output (folded, halved write traffic).
    xb = jax.random.normal(k3, (4, 8, D), dtype=jnp.bfloat16)
    wb = weight.astype(jnp.bfloat16)
    outb = jax.block_until_ready(rms_norm(xb, wb, eps))
    refb = rms_norm_ref(xb, wb, eps)
    assert outb.dtype == jnp.bfloat16
    assert jnp.allclose(outb.astype(jnp.float32), refb.astype(jnp.float32),
                        atol=2e-2, rtol=2e-2)

    # Case 4: elementwise_affine=False -> output in the input dtype.
    x4 = jax.random.normal(k1, (2, 8, D), dtype=jnp.float32)
    out4 = jax.block_until_ready(rms_norm(x4, None, eps))
    ref4 = rms_norm_ref(x4, None, eps)
    assert out4.dtype == x4.dtype
    assert jnp.allclose(out4, ref4, atol=1e-5, rtol=1e-5)

    print("KERNEL_OK")
</pallas_src>

<mosaic_0001>
module attributes {stable_mosaic.version = 11 : i64} {
  func.func @_rmsnorm_folded_kernel(%arg0: i32, %arg1: memref<8x128xf32, #tpu.memory_space<vmem>>, %arg2: memref<1x128xf32, #tpu.memory_space<vmem>>, %arg3: memref<128x128xf32, #tpu.memory_space<vmem>>, %arg4: memref<8x128xf32, #tpu.memory_space<vmem>>) attributes {dimension_semantics = [#tpu.dimension_semantics<parallel>], iteration_bounds = array<i64: 4>, scalar_prefetch = 0 : i64, scratch_operands = 0 : i64, tpu.core_type = #tpu.core_type<tc>, window_params = [{transform_indices = @transform_0, window_bounds = array<i64: 8, 128>}, {pipeline_mode = #tpu.pipeline_mode<synchronous>, transform_indices = @transform_1, window_bounds = array<i64: 1, 128>}, {pipeline_mode = #tpu.pipeline_mode<synchronous>, transform_indices = @transform_2, window_bounds = array<i64: 128, 128>}, {transform_indices = @transform_3, window_bounds = array<i64: 8, 128>}]} {
    %c0 = arith.constant 0 : index
    %c0_0 = arith.constant 0 : index
    %0 = vector.load %arg1[%c0, %c0_0] : memref<8x128xf32, #tpu.memory_space<vmem>>, vector<8x128xf32>
    %1 = arith.mulf %0, %0 : vector<8x128xf32>
    %c0_1 = arith.constant 0 : index
    %c0_2 = arith.constant 0 : index
    %2 = vector.load %arg3[%c0_1, %c0_2] : memref<128x128xf32, #tpu.memory_space<vmem>>, vector<128x128xf32>
    %cst = arith.constant dense<0.000000e+00> : vector<8x128xf32>
    %3 = tpu.matmul %1, %2, %cst {dimension_numbers = #tpu.dot_dimension_numbers<[1], [0], [0], [1], [0, 0, 1, 1], [], []>, precision = #tpu.contract_precision<fp32>} : vector<8x128xf32>, vector<128x128xf32>, vector<8x128xf32> -> vector<8x128xf32>
    %cst_3 = arith.constant 3.125000e-02 : f32
    %4 = vector.broadcast %cst_3 : f32 to vector<8x128xf32>
    %5 = arith.mulf %3, %4 : vector<8x128xf32>
    %cst_4 = arith.constant 9.99999997E-7 : f32
    %6 = vector.broadcast %cst_4 : f32 to vector<8x128xf32>
    %7 = arith.addf %5, %6 : vector<8x128xf32>
    %8 = math.rsqrt %7 : vector<8x128xf32>
    %9 = arith.mulf %0, %8 : vector<8x128xf32>
    %c0_5 = arith.constant 0 : index
    %c0_6 = arith.constant 0 : index
    %10 = vector.load %arg2[%c0_5, %c0_6] : memref<1x128xf32, #tpu.memory_space<vmem>>, vector<1x128xf32>
    %11 = vector.broadcast %10 : vector<1x128xf32> to vector<8x128xf32>
    %12 = arith.mulf %9, %11 : vector<8x128xf32>
    %c0_7 = arith.constant 0 : index
    %c0_8 = arith.constant 0 : index
    %13 = vector.load %arg4[%c0_7, %c0_8] : memref<8x128xf32, #tpu.memory_space<vmem>>, vector<8x128xf32>
    tpu.vector_store %arg4[%c0_7, %c0_8], %12 {strides = array<i32>} : memref<8x128xf32, #tpu.memory_space<vmem>>, vector<8x128xf32>,
    return
  }
  func.func @transform_0(%arg0: i32) -> (i32, i32) {
    %c0_i32 = arith.constant 0 : i32
    %c0_i32_0 = arith.constant 0 : i32
    return %arg0, %c0_i32 : i32, i32
  }
  func.func @transform_1(%arg0: i32) -> (i32, i32) {
    %c0_i32 = arith.constant 0 : i32
    %c0_i32_0 = arith.constant 0 : i32
    %c0_i32_1 = arith.constant 0 : i32
    return %c0_i32, %c0_i32_0 : i32, i32
  }
  func.func @transform_2(%arg0: i32) -> (i32, i32) {
    %c0_i32 = arith.constant 0 : i32
    %c0_i32_0 = arith.constant 0 : i32
    %c0_i32_1 = arith.constant 0 : i32
    return %c0_i32, %c0_i32_0 : i32, i32
  }
  func.func @transform_3(%arg0: i32) -> (i32, i32) {
    %c0_i32 = arith.constant 0 : i32
    %c0_i32_0 = arith.constant 0 : i32
    return %arg0, %c0_i32 : i32, i32
  }
}

</mosaic_0001>

<bundles_post_ra>
// kernel: tpu_custom_call.1
= control target key start
LH: loop header
LB: loop body
LE: loop exit
PB: predicated region body
PF: predicated region fallthrough
CT: control target
= control target key end

     0   :  { %8 = vsyncpa [#allocation3], 0  ;;  %s2038_s0 = inlined_call_operand.hbm [shape: f32[32,128], index: 0, kind: input, shape index: {}]   ;;  %s2039_s1 = inlined_call_operand.vmem [shape: f32[1,128], index: 1, kind: input, shape index: {}]   ;;  %s2040_s2 = inlined_call_operand.hbm [shape: f32[128,128], index: 2, kind: input, shape index: {}]   ;;  %s2041_s3 = inlined_call_operand.hbm [shape: f32[32,128], index: 3, kind: output, shape index: {}]  }
   0x1   :  { %10 = vsyncpa [#allocation3 + $0x1], 0 }
   0x2   :  { %11 = vsyncpa [#allocation6], 0 }
   0x3   :  { %12 = vsyncpa [#allocation4], 0 }
   0x4   :  { %14 = vsyncpa [#allocation4 + $0x1], 0  ;;  %s1508_s12 = smov 0   ;;  %s1510_s13 = smov 0  }
   0x5   :  { %s1512_s14 = smov 0   ;;  %s1514_s15 = smov 0  }
   0x6 LB: > { %s1529_s16 = sadd.s32 4294967295, %s1479_s15   ;;  %s967_s17 = sadd.s32 4294967294, %s1479_s15   ;;  %s1479_s15 = sphi %s1514_s15, %s2062_s15   ;;  %s1475_s14 = sphi %s1512_s14, %s2061_s14   ;;  %s1471_s13 = sphi %s1510_s13, %s2060_s13   ;;  %s1467_s12 = sphi %s1508_s12, %s2059_s12  }
   0x7   : > { %p40_p0 = scmp.ne.s32.totalorder %s1471_s13, %s1467_s12  ;;  %p2042_p1 = scmp.eq.s32.totalorder %s1529_s16, 0 }
   0x8   : > { %p112_p3 = scmp.eq.s32.totalorder %s967_s17, 3  ;;  %p968_p5 = scmp.ge.s32.totalorder %s1479_s15, 1 }
   0x9   : > { %p1538_p4 = por %p2042_p1, %p40_p0  ;;  %p119_p7 = scmp.lt.s32.totalorder %s1479_s15, 5 }
   0xa   : > { %p1543_p6 = por %p112_p3, %p40_p0  ;;  %s1481_s21 = smov [#allocation5]  }
   0xb   : > { %s2046_s18 = scalar_select %p1538_p4, 1, 0 }
   0xc   : > { %s2047_s19 = scalar_select %p1543_p6, 1, 0 }
   0xd   : > { %p1548_p8 = pnand %p968_p5, %p119_p7  ;;  %s134_s22 = sshll.u32 %s1481_s21, 4  ;;  %s135_s22 = int_to_ptr.vmem [resolvable:$true] %s134_s22 }
   0xe   : > { %s1561_s24 = sadd.s32 1, %s1479_s15   ;;  %s27_s25 = sadd.s32 1, %s1475_s14 }
   0xf   : > { %s2048_s20 = scalar_select %p1548_p8, 1, 0 }
  0x10   : > { %p1302_p9 = pneg %p1548_p8  ;;  %s24_s26 = ssub.s32 %s1479_s15, %s1561_s24 }
  0x11   : > { %s1368_s27 = scalar_lea.vmem %s135_s22, 2048  ;;  %p1376_p3 = scmp.lt.s32.totalorder %s135_s22, %s135_s22 }
  0x12   : > { %p1556_p10 = pnand %p1302_p9, %p2042_p1  ;;  %p1369_p12 = scmp.ne.s32.totalorder %s135_s22, %s1368_s27 }
  0x13   : > { %p1377_p5 = scmp.lt.s32.totalorder %s1368_s27, %s1368_s27 }
  0x14   : > { %p1359_p11 = pneg %p1556_p10 }
  0x15   : > { %p1378_p7 = por %p1377_p5, %p1376_p3 }
  0x16   : > { %p1371_p13 = pnand %p1369_p12, %p1359_p11 }
  0x18   : > { %p1372_p0 = pneg %p1371_p13 }
  0x1a   : > { %p1379_p2 = pnand %p1378_p7, %p1372_p0 }
  0x1c   : > { %1382 = shalt.err (!%p1379_p2)
}
  0x1d   : > { %s1482_s28 = smov 128   ;;  %s1483_s29 = smov 8  }
  0x1e   : > { %1305 = dma.hbm_to_vmem [thread:$0]  (!%p1556_p10), %s2040_s2, 2048, %s135_s22, [#allocation6], %s1482_s28, %s1482_s28, %s1483_s29  }
  0x1f   : > { %p25_p9 = scmp.eq.s32.totalorder %s24_s26, 0  ;;  %p34_p11 = scmp.ne.s32.totalorder %s1475_s14, %s1471_s13 }
  0x20   : > { %p35_p12 = scmp.eq.s32.totalorder %s1479_s15, 0  ;;  %p1315_p2 = scmp.lt.s32.totalorder %s1479_s15, 4 }
  0x21   : > { %s1578_s5 = scalar_select %p25_p9, %s1475_s14, %s27_s25  }
  0x22   : > { %p36_p13 = por %p35_p12, %p34_p11  ;;  %p2050_p0 = scmp.eq.s32.totalorder %s1529_s16, 3 }
  0x23   : > { %s148_s7 = sand.u32 1, %s1475_s14   ;;  %s972_s8 = sshll.u32 %s1479_s15, 7 }
  0x24   : > { %p1582_p3 = por %p2050_p0, %p34_p11  ;;  %s971_s9 = sshll.u32 %s148_s7, 3 }
  0x25   : > { %s1591_s17 = scalar_lea.hbm %s2038_s0, %s972_s8  ;;  %s152_s21 = scalar_lea.vmem [#allocation2], %s971_s9 }
  0x26   : > { %s2051_s6 = scalar_select %p1582_p3, 1, 0 }
  0x27   : > { %s159_s22 = sshll.u32 %s152_s21, 4  ;;  %p1593_p10 = pnand %p1315_p2, %p36_p13  ;;  %s160_s22 = int_to_ptr.vmem [resolvable:$true] %s159_s22 }
  0x28   : > { %s149_s25 = scalar_lea.sflag [#allocation3], %s148_s7  ;;  %s1383_s26 = scalar_lea.hbm %s1591_s17, 128 }
  0x29   : > { %p1384_p5 = scmp.ne.s32.totalorder %s1591_s17, %s1383_s26  ;;  %p1385_p7 = pneg %p1593_p10 }
  0x2a   : > { %s1388_s29 = scalar_lea.hbm %s2038_s0, 512  ;;  %p1389_p12 = scmp.lt.s32.totalorder %s1591_s17, %s2038_s0 }
  0x2b   : > { %p1386_p9 = pnand %p1385_p7, %p1384_p5  ;;  %p1390_p2 = scmp.lt.s32.totalorder %s1388_s29, %s1383_s26 }
  0x2d   : > { %p1387_p11 = pneg %p1386_p9  ;;  %p1391_p13 = por %p1390_p2, %p1389_p12 }
  0x2f   : > { %p1392_p0 = pnand %p1391_p13, %p1387_p11 }
  0x31   : > { %1395 = shalt.err (!%p1392_p0)
}
  0x32   : > { %s1396_s8 = scalar_lea.vmem %s160_s22, 128  ;;  %s1484_s7 = smov [#allocation2]  }
  0x33   : > { %p1397_p1 = scmp.ne.s32.totalorder %s160_s22, %s1396_s8  ;;  %s1401_s9 = sshll.u32 %s1484_s7, 4  ;;  %s1402_s9 = int_to_ptr.vmem [resolvable:$false] %s1401_s9 }
  0x34   : > { %s1403_s10 = scalar_lea.vmem %s1402_s9, 256  ;;  %p1404_p5 = scmp.lt.s32.totalorder %s160_s22, %s1402_s9 }
  0x35   : > { %p1399_p6 = pnand %p1397_p1, %p1385_p7  ;;  %p1405_p9 = scmp.lt.s32.totalorder %s1403_s10, %s1396_s8 }
  0x37   : > { %p1400_p3 = pneg %p1399_p6  ;;  %p1406_p4 = por %p1405_p9, %p1404_p5 }
  0x39   : > { %p1407_p8 = pnand %p1406_p4, %p1400_p3 }
  0x3b   : > { %1410 = shalt.err (!%p1407_p8)
}
  0x3c   : > { %1309 = dma.hbm_to_vmem [thread:$0]  (!%p1593_p10), %s1591_s17, 128, %s160_s22, %s149_s25  }
  0x3d   : > { %p2053_p11 = scmp.ne.s32.totalorder %s2048_s20, 0 }
  0x3e   : > { %s1614_s11 = sand.u32 (!%p2053_p11), 1, %s1471_s13   ;;  %p2054_p1 = scmp.ne.s32.totalorder (!%p2053_p11), %s2046_s18, 0 }
  0x3f   : > { %168 = sbr.rel (%p2053_p11) target bundleno = 412 (0x19c), region = 32  ;;  %s974_s21 = sshll.u32 (!%p2053_p11), %s1614_s11, 3 }
  0x40   : > { %s171_s26 = scalar_lea.sflag (!%p2053_p11), [#allocation3], %s1614_s11  ;;  %s1620_s27 = scalar_lea.vmem (!%p2053_p11), [#allocation2], %s974_s21 }
  0x44   : > { %1454 = dma.done.wait (%p2054_p1), %s171_s26, 128  }
  0x45   : > { %1456 = vsyncadd (%p2054_p1), %s171_s26, 4294967168  ;;  %p2055_p4 = scmp.eq.s32.totalorder %s1529_s16, 0 }
  0x47   : > { %1458 = dma.done.wait (%p2055_p4), [#allocation6], 2048   ;;  %p2056_p6 = pmov %p2055_p4 }
  0x48   : > { %v1485_v0 = vmov 0.0   ;;  %vm1486_vm0 = vmmov 0   ;;  %v218_v1 = vld [vmem:[#allocation5 + $0x78] sm:$0xff]  ;;  %v217_v2 = vld [vmem:[#allocation5 + $0x70] sm:$0xff]  ;;  %v216_v3 = vld [vmem:[#allocation5 + $0x68] sm:$0xff]  ;;  %s979_s17 = sshll.u32 %s1529_s16, 7 }
  0x49   : > { %1460 = vsyncadd (%p2056_p6), [#allocation6], 4294965248  ;;  %1084 = vmatprep.subr.mxu0 %v1485_v0  ;;  %1119 = vmatprep.subr.mxu1 %v1485_v0  ;;  %v1636_v4 = vand.u32 4294901760, %v218_v1  ;;  %v1638_v5 = vand.u32 4294901760, %v217_v2  ;;  %v1640_v6 = vand.u32 4294901760, %v216_v3  ;;  %v215_v7 = vld [vmem:[#allocation5 + $0x60] sm:$0xff]  ;;  %s885_s29 = scalar_lea.hbm %s2041_s3, %s979_s17 }
  0x4a   : > { %1116 = vmatprep.mubr.msk.f32.mxu0 %vm1486_vm0, %v1485_v0  ;;  %1151 = vmatprep.mubr.msk.f32.mxu1 %vm1486_vm0, %v1485_v0  ;;  %v214_v8 = vld [vmem:[#allocation5 + $0x58] sm:$0xff]  ;;  %v213_v9 = vld [vmem:[#allocation5 + $0x50] sm:$0xff]  ;;  %v1642_v10 = vand.u32 4294901760, %v215_v7  ;;  %v212_v13 = vld [vmem:[#allocation5 + $0x48] sm:$0xff]  ;;  %s200_s22 = scalar_lea.vmem [#allocation7], %s974_s21  ;;  %s874_s30 = scalar_lea.sflag [#allocation4], %s1614_s11 }
  0x4b   : > { %v1644_v11 = vand.u32 4294901760, %v214_v8  ;;  %v1646_v12 = vand.u32 4294901760, %v213_v9  ;;  %v211_v14 = vld [vmem:[#allocation5 + $0x40] sm:$0xff]  ;;  %1085 = vmatpush3.msra.mxu0 %v1636_v4  ;;  %v1650_v15 = vsub.f32 %v218_v1, %v1636_v4  ;;  %v1653_v16 = vsub.f32 %v217_v2, %v1638_v5  ;;  %v210_v19 = vld [vmem:[#allocation5 + $0x38] sm:$0xff]  ;;  %v209_v26 = vld [vmem:[#allocation5 + $0x30] sm:$0xff]  ;;  %s887_s23 = sshll.u32 %s200_s22, 4  ;;  %s888_s23 = int_to_ptr.vmem [resolvable:$true] %s887_s23 }
  0x4c   : > { %v1655_v17 = vand.u32 4294901760, %v212_v13  ;;  %v1658_v18 = vsub.f32 %v216_v3, %v1640_v6  ;;  %1086 = vmatprep.subr.mxu0 %v1485_v0  ;;  %v1662_v20 = vsub.f32 %v215_v7, %v1642_v10  ;;  %v1671_v25 = vand.u32 4294901760, %v211_v14  ;;  %v208_v34 = vld [vmem:[#allocation5 + $0x28] sm:$0xff]  ;;  %v207_v41 = vld [vmem:[#allocation5 + $0x20] sm:$0xff]  ;;  %v1717_v48 = vld [vmem:[%s1620_s27] sm:$0xff]  ;;  %s1411_s4 = scalar_lea.vmem %s888_s23, 128 }
  0x4d   : > { %v1665_v21 = vsub.f32 %v214_v8, %v1644_v11  ;;  %1087 = vmatpush3.msra.mxu0 %v1638_v5  ;;  %v313_v22 = vand.u32 4294901760, %v1650_v15  ;;  %v320_v23 = vand.u32 4294901760, %v1653_v16  ;;  %v1675_v28 = vand.u32 4294901760, %v210_v19  ;;  %v206_v50 = vld [vmem:[#allocation5 + $0x18] sm:$0xff]  ;;  %v205_v54 = vld [vmem:[#allocation5 + $0x10] sm:$0xff]  ;;  %v204_v61 = vld [vmem:[#allocation5 + $0x8] sm:$0xff]  ;;  %p1412_p8 = scmp.ne.s32.totalorder %s888_s23, %s1411_s4 }
  0x4e   : > { %v327_v24 = vand.u32 4294901760, %v1658_v18  ;;  %1088 = vmatprep.subr.mxu0 %v1485_v0  ;;  %v334_v27 = vand.u32 4294901760, %v1662_v20  ;;  %v1679_v30 = vsub.f32 %v213_v9, %v1646_v12  ;;  %v1692_v35 = vsub.f32 %v212_v13, %v1655_v17  ;;  %v203_v8 = vld [vmem:[#allocation5] sm:$0xff]  ;;  %p2057_p3 = scmp.ne.s32.totalorder %s2051_s6, 0  ;;  %s1487_s8 = smov [#allocation7]  }
  0x4f   : > { %v341_v29 = vand.u32 4294901760, %v1665_v21  ;;  %1089 = vmatpush3.msra.mxu0 %v1640_v6  ;;  %v314_v31 = vsub.f32 %v1650_v15, %v313_v22  ;;  %v321_v32 = vsub.f32 %v1653_v16, %v320_v23  ;;  %v1695_v36 = vand.u32 4294901760, %v209_v26  ;;  %s1415_s16 = sshll.u32 %s1487_s8, 4  ;;  %s1416_s16 = int_to_ptr.vmem [resolvable:$false] %s1415_s16 }
  0x50   : > { %v328_v33 = vsub.f32 %v1658_v18, %v327_v24  ;;  %1090 = vmatprep.subr.mxu0 %v1485_v0  ;;  %v335_v39 = vsub.f32 %v1662_v20, %v334_v27  ;;  %v348_v40 = vand.u32 4294901760, %v1679_v30  ;;  %v1703_v42 = vand.u32 4294901760, %v208_v34  ;;  %p1413_p10 = pnand %p1412_p8, %p2057_p3  ;;  %s1417_s7 = scalar_lea.vmem %s1416_s16, 256 }
  0x51   : > { %1091 = vmatpush3.msra.mxu0 %v1642_v10  ;;  %v315_v37 = vand.u32 4294901760, %v314_v31  ;;  %v322_v38 = vand.u32 4294901760, %v321_v32  ;;  %v1706_v43 = vsub.f32 %v211_v14, %v1671_v25  ;;  %v342_v45 = vsub.f32 %v1665_v21, %v341_v29  ;;  %p1418_p12 = scmp.lt.s32.totalorder %s888_s23, %s1416_s16  ;;  %p1419_p2 = scmp.lt.s32.totalorder %s1417_s7, %s1411_s4 }
  0x52   : > { %1092 = vmatprep.subr.mxu0 %v1485_v0  ;;  %v329_v44 = vand.u32 4294901760, %v328_v33  ;;  %v355_v46 = vand.u32 4294901760, %v1692_v35  ;;  %v1714_v47 = vsub.f32 %v210_v19, %v1675_v28  ;;  %v1721_v49 = vand.u32 4294901760, %v207_v41  ;;  %p1414_p7 = pneg %p1413_p10 }
  0x53   : > { %1093 = vmatpush3.msra.mxu0 %v1644_v11  ;;  %1120 = vmatpush3.msra.mxu1 %v315_v37  ;;  %v336_v51 = vand.u32 4294901760, %v335_v39  ;;  %v349_v52 = vsub.f32 %v1679_v30, %v348_v40  ;;  %v362_v53 = vand.u32 4294901760, %v1706_v43  ;;  %v1729_v55 = vsub.f32 %v209_v26, %v1695_v36  ;;  %p1420_p13 = por %p1419_p2, %p1418_p12 }
  0x54   : > { %1094 = vmatprep.subr.mxu0 %v1485_v0  ;;  %1121 = vmatprep.subr.mxu1 %v1485_v0  ;;  %v369_v56 = vand.u32 4294901760, %v1714_v47  ;;  %v202_v57 = vmul.f32 %v1717_v48, %v1717_v48  ;;  %v343_v58 = vand.u32 4294901760, %v342_v45  ;;  %v356_v59 = vsub.f32 %v1692_v35, %v355_v46 }
  0x55   : > { %1095 = vmatpush3.msra.mxu0 %v1646_v12  ;;  %1122 = vmatpush3.msra.mxu1 %v322_v38  ;;  %v1740_v60 = vand.u32 4294901760, %v206_v50  ;;  %v1743_v62 = vsub.f32 %v208_v34, %v1703_v42  ;;  %v1747_v63 = vand.u32 4294901760, %v205_v54  ;;  %v350_v2 = vand.u32 4294901760, %v349_v52  ;;  %p1421_p0 = pnand %p1420_p13, %p1414_p7 }
  0x56   : > { %1096 = vmatprep.subr.mxu0 %v1485_v0  ;;  %1123 = vmatprep.subr.mxu1 %v1485_v0  ;;  %v1749_v1 = vand.u32 4294901760, %v202_v57  ;;  %v363_v3 = vsub.f32 %v1706_v43, %v362_v53  ;;  %v376_v7 = vand.u32 4294901760, %v1729_v55  ;;  %v1757_v9 = vsub.f32 %v207_v41, %v1721_v49 }
  0x57   : > { %1097 = vmatpush3.msra.mxu0 %v1655_v17  ;;  %1124 = vmatpush3.msra.mxu1 %v329_v44  ;;  %v370_v13 = vsub.f32 %v1714_v47, %v369_v56  ;;  %v1764_v14 = vand.u32 4294901760, %v204_v61  ;;  %v357_v19 = vand.u32 4294901760, %v356_v59  ;;  %v383_v26 = vand.u32 4294901760, %v1743_v62 }
  0x58   : > { %1098 = vmatprep.subr.mxu0 %v1485_v0  ;;  %1125 = vmatprep.subr.mxu1 %v1485_v0  ;;  %v1769_v31 = vsub.f32 %v202_v57, %v1749_v1  ;;  %v1772_v32 = vsub.f32 %v206_v50, %v1740_v60  ;;  %v1776_v33 = vand.u32 4294901760, %v203_v8  ;;  %v364_v34 = vand.u32 4294901760, %v363_v3 }
  0x59   : > { %1099 = vmatpush3.msra.mxu0 %v1671_v25  ;;  %1126 = vmatpush3.msra.mxu1 %v336_v51  ;;  %v377_v37 = vsub.f32 %v1729_v55, %v376_v7  ;;  %v390_v38 = vand.u32 4294901760, %v1757_v9  ;;  %v1784_v39 = vsub.f32 %v205_v54, %v1747_v63  ;;  %v371_v41 = vand.u32 4294901760, %v370_v13 }
  0x5a   : > { %1100 = vmatprep.subr.mxu0 %v1485_v0  ;;  %1127 = vmatprep.subr.mxu1 %v1485_v0  ;;  %v384_v44 = vsub.f32 %v1743_v62, %v383_v26  ;;  %v302_v45 = vand.u32 4294901760, %v1769_v31  ;;  %v397_v50 = vand.u32 4294901760, %v1772_v32  ;;  %v1795_v51 = vsub.f32 %v204_v61, %v1764_v14 }
  0x5b   : > { %1101 = vmatpush3.msra.mxu0 %v1675_v28  ;;  %1128 = vmatpush3.msra.mxu1 %v343_v58  ;;  %v378_v52 = vand.u32 4294901760, %v377_v37  ;;  %v391_v54 = vsub.f32 %v1757_v9, %v390_v38  ;;  %v404_v57 = vand.u32 4294901760, %v1784_v39  ;;  %v1805_v58 = vsub.f32 %v203_v8, %v1776_v33 }
  0x5c   : > { %1102 = vmatprep.subr.mxu0 %v1485_v0  ;;  %1129 = vmatprep.subr.mxu1 %v1485_v0  ;;  %v385_v59 = vand.u32 4294901760, %v384_v44  ;;  %v303_v61 = vsub.f32 %v1769_v31, %v302_v45  ;;  %v411_v3 = vand.u32 4294901760, %v1795_v51 }
  0x5d   : > { %1103 = vmatpush3.msra.mxu0 %v1695_v36  ;;  %1130 = vmatpush3.msra.mxu1 %v350_v2  ;;  %v398_v2 = vsub.f32 %v1772_v32, %v397_v50  ;;  %v392_v8 = vand.u32 4294901760, %v391_v54  ;;  %v405_v13 = vsub.f32 %v1784_v39, %v404_v57 }
  0x5e   : > { %1104 = vmatprep.subr.mxu0 %v1485_v0  ;;  %1131 = vmatprep.subr.mxu1 %v1485_v0 }
  0x5f   : > { %1105 = vmatpush3.msra.mxu0 %v1703_v42  ;;  %1132 = vmatpush3.msra.mxu1 %v357_v19  ;;  %v418_v19 = vand.u32 4294901760, %v1805_v58  ;;  %v399_v37 = vand.u32 4294901760, %v398_v2  ;;  %v406_v44 = vand.u32 4294901760, %v405_v13 }
  0x60   : > { %1106 = vmatprep.subr.mxu0 %v1485_v0  ;;  %1133 = vmatprep.subr.mxu1 %v1485_v0 }
  0x61   : > { %1107 = vmatpush3.msra.mxu0 %v1721_v49  ;;  %1134 = vmatpush3.msra.mxu1 %v364_v34  ;;  %v304_v34 = vand.u32 4294901760, %v303_v61 }
  0x62   : > { %1108 = vmatprep.subr.mxu0 %v1485_v0  ;;  %1135 = vmatprep.subr.mxu1 %v1485_v0 }
  0x63   : > { %1109 = vmatpush3.msra.mxu0 %v1740_v60  ;;  %1136 = vmatpush3.msra.mxu1 %v371_v41  ;;  %v412_v41 = vsub.f32 %v1795_v51, %v411_v3 }
  0x64   : > { %1110 = vmatprep.subr.mxu0 %v1485_v0  ;;  %1137 = vmatprep.subr.mxu1 %v1485_v0 }
  0x65   : > { %1111 = vmatpush3.msra.mxu0 %v1747_v63  ;;  %1138 = vmatpush3.msra.mxu1 %v378_v52  ;;  %v419_v52 = vsub.f32 %v1805_v58, %v418_v19  ;;  %v413_v54 = vand.u32 4294901760, %v412_v41 }
  0x66   : > { %1112 = vmatprep.subr.mxu0 %v1485_v0  ;;  %1139 = vmatprep.subr.mxu1 %v1485_v0 }
  0x67   : > { %1113 = vmatpush3.msra.mxu0 %v1764_v14  ;;  %1140 = vmatpush3.msra.mxu1 %v385_v59  ;;  %v420_v59 = vand.u32 4294901760, %v419_v52 }
  0x68   : > { %1114 = vmatprep.subr.mxu0 %v1485_v0  ;;  %1141 = vmatprep.subr.mxu1 %v1485_v0 }
  0x69   : > { %1115 = vmatpush3.msra.mxu0 %v1776_v33  ;;  %1142 = vmatpush3.msra.mxu1 %v392_v8 }
  0x6a   : > { %1143 = vmatprep.subr.mxu1 %v1485_v0  ;;  %1154 = vmatprep.subr.mxu0 %v1485_v0 }
  0x6b   : > { %1117 = vmatmul.mubr.f32.vlgmr.msra.gmra.mxu0 %v304_v34  ;;  %1144 = vmatpush3.msra.mxu1 %v399_v37 }
  0x6c   : > { %1155 = vmatpush3.msra.mxu0 %v1650_v15  ;;  %1145 = vmatprep.subr.mxu1 %v1485_v0 }
  0x6d   : > { %1156 = vmatprep.subr.mxu0 %v1485_v0  ;;  %1146 = vmatpush3.msra.mxu1 %v406_v44 }
  0x6e   : > { %1157 = vmatpush3.msra.mxu0 %v1653_v16  ;;  %1147 = vmatprep.subr.mxu1 %v1485_v0 }
  0x6f   : > { %1158 = vmatprep.subr.mxu0 %v1485_v0  ;;  %1148 = vmatpush3.msra.mxu1 %v413_v54 }
  0x70   : > { %1159 = vmatpush3.msra.mxu0 %v1658_v18  ;;  %1149 = vmatprep.subr.mxu1 %v1485_v0 }
  0x71   : > { %1160 = vmatprep.subr.mxu0 %v1485_v0  ;;  %1150 = vmatpush3.msra.mxu1 %v420_v59 }
  0x72   : > { %1161 = vmatpush3.msra.mxu0 %v1662_v20  ;;  %1152 = vmatmul.mubr.f32.vlgmr.msra.gmra.mxu1 %v1749_v1 }
  0x73   : > { %1162 = vmatprep.subr.mxu0 %v1485_v0  ;;  %1189 = vmatprep.subr.mxu1 %v1485_v0 }
  0x74   : > { %1163 = vmatpush3.msra.mxu0 %v1665_v21  ;;  %1190 = vmatpush3.msra.mxu1 %v1636_v4 }
  0x75   : > { %1164 = vmatprep.subr.mxu0 %v1485_v0  ;;  %1191 = vmatprep.subr.mxu1 %v1485_v0 }
  0x76   : > { %1165 = vmatpush3.msra.mxu0 %v1679_v30  ;;  %1192 = vmatpush3.msra.mxu1 %v1638_v5  ;;  %v977_v30 = vld [vmem:[%s2039_s1] ss:$0 sm:$0xff] }
  0x77   : > { %1166 = vmatprep.subr.mxu0 %v1485_v0  ;;  %1193 = vmatprep.subr.mxu1 %v1485_v0 }
  0x78   : > { %1167 = vmatpush3.msra.mxu0 %v1692_v35  ;;  %1194 = vmatpush3.msra.mxu1 %v1640_v6 }
  0x79   : > { %1168 = vmatprep.subr.mxu0 %v1485_v0  ;;  %1195 = vmatprep.subr.mxu1 %v1485_v0 }
  0x7a   : > { %1169 = vmatpush3.msra.mxu0 %v1706_v43  ;;  %1196 = vmatpush3.msra.mxu1 %v1642_v10 }
  0x7b   : > { %1170 = vmatprep.subr.mxu0 %v1485_v0  ;;  %1197 = vmatprep.subr.mxu1 %v1485_v0 }
  0x7c   : > { %1171 = vmatpush3.msra.mxu0 %v1714_v47  ;;  %1198 = vmatpush3.msra.mxu1 %v1644_v11 }
  0x7d   : > { %1172 = vmatprep.subr.mxu0 %v1485_v0  ;;  %1199 = vmatprep.subr.mxu1 %v1485_v0 }
  0x7e   : > { %1173 = vmatpush3.msra.mxu0 %v1729_v55  ;;  %1200 = vmatpush3.msra.mxu1 %v1646_v12 }
  0x7f   : > { %1174 = vmatprep.subr.mxu0 %v1485_v0  ;;  %1201 = vmatprep.subr.mxu1 %v1485_v0 }
  0x80   : > { %1175 = vmatpush3.msra.mxu0 %v1743_v62  ;;  %1202 = vmatpush3.msra.mxu1 %v1655_v17 }
  0x81   : > { %1176 = vmatprep.subr.mxu0 %v1485_v0  ;;  %1203 = vmatprep.subr.mxu1 %v1485_v0 }
  0x82   : > { %1177 = vmatpush3.msra.mxu0 %v1757_v9  ;;  %1204 = vmatpush3.msra.mxu1 %v1671_v25 }
  0x83   : > { %1178 = vmatprep.subr.mxu0 %v1485_v0  ;;  %1205 = vmatprep.subr.mxu1 %v1485_v0 }
  0x84   : > { %1179 = vmatpush3.msra.mxu0 %v1772_v32  ;;  %1206 = vmatpush3.msra.mxu1 %v1675_v28 }
  0x85   : > { %1180 = vmatprep.subr.mxu0 %v1485_v0  ;;  %1207 = vmatprep.subr.mxu1 %v1485_v0 }
  0x86   : > { %1181 = vmatpush3.msra.mxu0 %v1784_v39  ;;  %1208 = vmatpush3.msra.mxu1 %v1695_v36 }
  0x87   : > { %1182 = vmatprep.subr.mxu0 %v1485_v0  ;;  %1209 = vmatprep.subr.mxu1 %v1485_v0 }
  0x88   : > { %1183 = vmatpush3.msra.mxu0 %v1795_v51  ;;  %1210 = vmatpush3.msra.mxu1 %v1703_v42 }
  0x89   : > { %1184 = vmatprep.subr.mxu0 %v1485_v0  ;;  %1211 = vmatprep.subr.mxu1 %v1485_v0 }
  0x8a   : > { %1185 = vmatpush3.msra.mxu0 %v1805_v58  ;;  %1186 = vmatprep.mubr.msk.f32.mxu0 %vm1486_vm0, %v1485_v0 }
  0x8b   : > { %1212 = vmatpush3.msra.mxu1 %v1721_v49  ;;  %1187 = vmatmul.mubr.f32.vlgmr.msra.gmra.mxu0 %v1769_v31 }
  0x8c   : > { %1213 = vmatprep.subr.mxu1 %v1485_v0  ;;  %1224 = vmatprep.subr.mxu0 %v1485_v0 }
  0x8d   : > { %1214 = vmatpush3.msra.mxu1 %v1740_v60  ;;  %1225 = vmatpush3.msra.mxu0 %v313_v22 }
  0x8e   : > { %1215 = vmatprep.subr.mxu1 %v1485_v0  ;;  %1226 = vmatprep.subr.mxu0 %v1485_v0 }
  0x8f   : > { %1216 = vmatpush3.msra.mxu1 %v1747_v63  ;;  %1227 = vmatpush3.msra.mxu0 %v320_v23 }
  0x90   : > { %1217 = vmatprep.subr.mxu1 %v1485_v0  ;;  %1228 = vmatprep.subr.mxu0 %v1485_v0 }
  0x91   : > { %1218 = vmatpush3.msra.mxu1 %v1764_v14  ;;  %1229 = vmatpush3.msra.mxu0 %v327_v24 }
  0x92   : > { %1219 = vmatprep.subr.mxu1 %v1485_v0  ;;  %1230 = vmatprep.subr.mxu0 %v1485_v0 }
  0x93   : > { %1220 = vmatpush3.msra.mxu1 %v1776_v33  ;;  %1221 = vmatprep.mubr.msk.f32.mxu1 %vm1486_vm0, %v1485_v0 }
  0x94   : > { %1231 = vmatpush3.msra.mxu0 %v334_v27  ;;  %1222 = vmatmul.mubr.f32.vlgmr.msra.gmra.mxu1 %v302_v45 }
  0x95   : > { %1232 = vmatprep.subr.mxu0 %v1485_v0  ;;  %1259 = vmatprep.subr.mxu1 %v1485_v0 }
  0x96   : > { %1233 = vmatpush3.msra.mxu0 %v341_v29  ;;  %1260 = vmatpush3.msra.mxu1 %v1636_v4 }
  0x97   : > { %1234 = vmatprep.subr.mxu0 %v1485_v0  ;;  %1261 = vmatprep.subr.mxu1 %v1485_v0 }
  0x98   : > { %1235 = vmatpush3.msra.mxu0 %v348_v40  ;;  %1262 = vmatpush3.msra.mxu1 %v1638_v5 }
  0x99   : > { %1236 = vmatprep.subr.mxu0 %v1485_v0  ;;  %1263 = vmatprep.subr.mxu1 %v1485_v0 }
  0x9a   : > { %1237 = vmatpush3.msra.mxu0 %v355_v46  ;;  %1264 = vmatpush3.msra.mxu1 %v1640_v6 }
  0x9b   : > { %1238 = vmatprep.subr.mxu0 %v1485_v0  ;;  %1265 = vmatprep.subr.mxu1 %v1485_v0 }
  0x9c   : > { %1239 = vmatpush3.msra.mxu0 %v362_v53  ;;  %1266 = vmatpush3.msra.mxu1 %v1642_v10 }
  0x9d   : > { %1240 = vmatprep.subr.mxu0 %v1485_v0  ;;  %1267 = vmatprep.subr.mxu1 %v1485_v0 }
  0x9e   : > { %1241 = vmatpush3.msra.mxu0 %v369_v56  ;;  %1268 = vmatpush3.msra.mxu1 %v1644_v11 }
  0x9f   : > { %1242 = vmatprep.subr.mxu0 %v1485_v0  ;;  %1269 = vmatprep.subr.mxu1 %v1485_v0 }
  0xa0   : > { %1243 = vmatpush3.msra.mxu0 %v376_v7  ;;  %1270 = vmatpush3.msra.mxu1 %v1646_v12 }
  0xa1   : > { %1244 = vmatprep.subr.mxu0 %v1485_v0  ;;  %1271 = vmatprep.subr.mxu1 %v1485_v0 }
  0xa2   : > { %1245 = vmatpush3.msra.mxu0 %v383_v26  ;;  %1272 = vmatpush3.msra.mxu1 %v1655_v17 }
  0xa3   : > { %1246 = vmatprep.subr.mxu0 %v1485_v0  ;;  %1273 = vmatprep.subr.mxu1 %v1485_v0 }
  0xa4   : > { %1247 = vmatpush3.msra.mxu0 %v390_v38  ;;  %1274 = vmatpush3.msra.mxu1 %v1671_v25 }
  0xa5   : > { %1248 = vmatprep.subr.mxu0 %v1485_v0  ;;  %1275 = vmatprep.subr.mxu1 %v1485_v0 }
  0xa6   : > { %1249 = vmatpush3.msra.mxu0 %v397_v50  ;;  %1276 = vmatpush3.msra.mxu1 %v1675_v28 }
  0xa7   : > { %1250 = vmatprep.subr.mxu0 %v1485_v0  ;;  %1277 = vmatprep.subr.mxu1 %v1485_v0 }
  0xa8   : > { %1251 = vmatpush3.msra.mxu0 %v404_v57  ;;  %1278 = vmatpush3.msra.mxu1 %v1695_v36 }
  0xa9   : > { %1252 = vmatprep.subr.mxu0 %v1485_v0  ;;  %1279 = vmatprep.subr.mxu1 %v1485_v0 }
  0xaa   : > { %1253 = vmatpush3.msra.mxu0 %v411_v3  ;;  %1280 = vmatpush3.msra.mxu1 %v1703_v42 }
  0xab   : > { %1254 = vmatprep.subr.mxu0 %v1485_v0  ;;  %1281 = vmatprep.subr.mxu1 %v1485_v0 }
  0xac   : > { %1255 = vmatpush3.msra.mxu0 %v418_v19  ;;  %1256 = vmatprep.mubr.msk.f32.mxu0 %vm1486_vm0, %v1485_v0 }
  0xad   : > { %1282 = vmatpush3.msra.mxu1 %v1721_v49  ;;  %1257 = vmatmul.mubr.f32.vlgmr.msra.gmra.mxu0 %v1749_v1 }
  0xae   : > { %1283 = vmatprep.subr.mxu1 %v1485_v0  ;;  %1291 = vmatprep.mubr.msk.f32.mxu1 %vm1486_vm0, %v1485_v0 }
  0xaf   : > { %1284 = vmatpush3.msra.mxu1 %v1740_v60 }
  0xb0   : > { %1285 = vmatprep.subr.mxu1 %v1485_v0 }
  0xb1   : > { %1286 = vmatpush3.msra.mxu1 %v1747_v63 }
  0xb2   : > { %1287 = vmatprep.subr.mxu1 %v1485_v0 }
  0xb3   : > { %1288 = vmatpush3.msra.mxu1 %v1764_v14 }
  0xb4   : > { %1289 = vmatprep.subr.mxu1 %v1485_v0 }
  0xb5   : > { %1290 = vmatpush3.msra.mxu1 %v1776_v33 }
  0xb6   : > { %1292 = vmatmul.mubr.f32.vlgmr.msra.gmra.mxu1 %v1749_v1 }
 0x12b   : > { %v306_v4 = vpop.f32.mrf.mxu0 }
 0x12d   : > { %v1118_v5 = vpop.f32.mrf.mxu0 }
 0x132   : > { %v457_v6 = vpop.f32.mrf.mxu1 }
 0x133   : > { %v458_v18 = vadd.f32 %v457_v6, %v306_v4 }
 0x134   : > { %v1153_v10 = vpop.f32.mrf.mxu1 }
 0x14b   : > { %v561_v11 = vpop.f32.mrf.mxu0 }
 0x14c   : > { %v562_v21 = vadd.f32 %v561_v11, %v458_v18 }
 0x14d   : > { %v1188_v12 = vpop.f32.mrf.mxu0 }
 0x154   : > { %v650_v15 = vpop.f32.mrf.mxu1 }
 0x155   : > { %v651_v22 = vadd.f32 %v650_v15, %v562_v21 }
 0x156   : > { %v1223_v16 = vpop.f32.mrf.mxu1 }
 0x16d   : > { %v769_v17 = vpop.f32.mrf.mxu0 }
 0x16e   : > { %v770_v0 = vadd.f32 %v769_v17, %v651_v22 }
 0x16f   : > { %v1258_v20 = vpop.f32.mrf.mxu0 }
 0x176   : > { %v856_v23 = vpop.f32.mrf.mxu1 }
 0x177   : > { %v857_v24 = vadd.f32 %v856_v23, %v770_v0 }
 0x178   : > { %v1293_v25 = vpop.f32.mrf.mxu1 }
 0x179   : > { %v860_v27 = vmul.f32 0.03125, %v857_v24 }
 0x17b   : > { %v861_v28 = vadd.f32 1e-06, %v860_v27 }
 0x17d   : > { %1355 = vrsqrt.f32 %v861_v28 }
 0x18a   : > { %v1356_v29 = vpop.eup %1355 }
 0x18b   : > { %v863_v35 = vmul.f32 %v1356_v29, %v1717_v48 }
 0x18d   : > { %v871_v36 = vmul.f32 %v977_v30, %v863_v35 }
 0x18f   : > { %872 = vst [vmem:[%s200_s22] sm:$0xff] %v871_v36 }
 0x190   : > { %1424 = shalt.err (!%p1421_p0)
}
 0x191   : > { %s1425_s9 = scalar_lea.hbm %s885_s29, 128  ;;  %s1429_s21 = scalar_lea.hbm %s2041_s3, 512 }
 0x192   : > { %p1426_p5 = scmp.ne.s32.totalorder %s885_s29, %s1425_s9  ;;  %p1430_p1 = scmp.lt.s32.totalorder %s885_s29, %s2041_s3 }
 0x193   : > { %p1431_p4 = scmp.lt.s32.totalorder %s1429_s21, %s1425_s9 }
 0x194   : > { %p1427_p9 = pnand %p1426_p5, %p2057_p3 }
 0x195   : > { %p1432_p6 = por %p1431_p4, %p1430_p1 }
 0x196   : > { %p1428_p11 = pneg %p1427_p9 }
 0x198   : > { %p1433_p8 = pnand %p1432_p6, %p1428_p11 }
 0x19a   : > { %1436 = shalt.err (!%p1433_p8)
}
 0x19b   : > { %1300 = dma.vmem_to_hbm [thread:$0]  (%p2057_p3), %s888_s23, 128, %s885_s29, %s874_s30  }
 0x19c PF: > { %p1317_p10 = scmp.ge.s32.totalorder %s1479_s15, 2  ;;  %s899_s18 = sand.u32 1, %s1467_s12  }
 0x19d   : > { %p2058_p7 = scmp.ne.s32.totalorder %s2047_s19, 0  ;;  %s900_s20 = scalar_lea.sflag [#allocation4], %s899_s18 }
 0x19f   : > { %p1311_p12 = pnand %p1317_p10, %p2058_p7 }
 0x1a1   : > { %p1312_p2 = pneg %p1311_p12 }
 0x1a3   : > { %1462 = dma.done.wait (%p1312_p2), %s900_s20, 128  }
 0x1a4   : > { %1464 = vsyncadd (%p1312_p2), %s900_s20, 4294967168  ;;  %p17_p13 = scmp.ge.s32.totalorder %s1561_s24, 6   ;;  %s2059_s12 = smov %s1471_s13 }
 0x1a5   : > { %s2060_s13 = smov %s1475_s14  ;;  %s2061_s14 = smov %s1578_s5 }
 0x1a6   : > { %s2062_s15 = smov %s1561_s24  ;;  %19 = sbr.rel (!%p17_p13) target bundleno = 6 (0x6), region = 81 }
 0x1ab   :  { %905 = vsyncpa [#allocation3], 1 }
 0x1ac   :  { %907 = vsyncpa [#allocation3 + $0x1], 1 }
 0x1ad   :  { %908 = vsyncpa [#allocation6], 1 }
 0x1ae   :  { %909 = vsyncpa [#allocation4], 1 }
 0x1af   :  { %911 = vsyncpa [#allocation4 + $0x1], 1 }

</bundles_post_ra>
